<compile_context>
chip_gen: v6e
topology: v6e:2x2x1
jax: 0.10.0
libtpu: 0.0.40
codegen_flags: <defaults>
</compile_context>

<pallas_src>
import jax
import jax.numpy as jnp
from jax.experimental import pallas as pl
from jax.experimental.pallas import tpu as pltpu


# ---------------------------------------------------------------------------
# Kernels.  grid = (num_batch_tiles, num_class_tiles); class axis is last and
# "arbitrary" (online LSE accumulation), batch axis is "parallel".
# ---------------------------------------------------------------------------

def _ce_int_labels_kernel(x_ref, lbl_ref, loss_ref, m_run, l_run, xl_acc):
    k = pl.program_id(1)

    @pl.when(k == 0)
    def _init():
        m_run[...] = jnp.full(m_run.shape, -jnp.inf, dtype=jnp.float32)
        l_run[...] = jnp.zeros(l_run.shape, dtype=jnp.float32)
        xl_acc[...] = jnp.zeros(xl_acc.shape, dtype=jnp.float32)

    x = x_ref[...].astype(jnp.float32)          # (TB, TC) upcast in VMEM
    lbl = lbl_ref[...]                          # (TB, 1) int32
    tb, tc = x.shape

    # Gather the logit at the target class (it lives in exactly one class tile).
    col = k * tc + jax.lax.broadcasted_iota(jnp.int32, (tb, tc), 1)
    hit = col == lbl
    xl_acc[...] += jnp.sum(jnp.where(hit, x, 0.0), axis=1, keepdims=True)

    # Online max / sum-exp across class tiles.
    m_prev = m_run[...]
    m_new = jnp.maximum(m_prev, jnp.max(x, axis=1, keepdims=True))
    l_run[...] = l_run[...] * jnp.exp(m_prev - m_new) + jnp.sum(
        jnp.exp(x - m_new), axis=1, keepdims=True)
    m_run[...] = m_new

    @pl.when(k == pl.num_programs(1) - 1)
    def _finalize():
        # -log_softmax(x)[label] = m + log(sum exp(x - m)) - x[label]
        loss_ref[...] = m_run[...] + jnp.log(l_run[...]) - xl_acc[...]


def _ce_soft_targets_kernel(x_ref, t_ref, loss_ref, m_run, l_run, tx_acc, t_acc):
    k = pl.program_id(1)

    @pl.when(k == 0)
    def _init():
        m_run[...] = jnp.full(m_run.shape, -jnp.inf, dtype=jnp.float32)
        l_run[...] = jnp.zeros(l_run.shape, dtype=jnp.float32)
        tx_acc[...] = jnp.zeros(tx_acc.shape, dtype=jnp.float32)
        t_acc[...] = jnp.zeros(t_acc.shape, dtype=jnp.float32)

    x = x_ref[...].astype(jnp.float32)          # (TB, TC)
    t = t_ref[...].astype(jnp.float32)          # (TB, TC)

    tx_acc[...] += jnp.sum(t * x, axis=1, keepdims=True)
    t_acc[...] += jnp.sum(t, axis=1, keepdims=True)

    m_prev = m_run[...]
    m_new = jnp.maximum(m_prev, jnp.max(x, axis=1, keepdims=True))
    l_run[...] = l_run[...] * jnp.exp(m_prev - m_new) + jnp.sum(
        jnp.exp(x - m_new), axis=1, keepdims=True)
    m_run[...] = m_new

    @pl.when(k == pl.num_programs(1) - 1)
    def _finalize():
        lse = m_run[...] + jnp.log(l_run[...])
        # sum_c -t_c * (x_c - lse) = (sum_c t_c) * lse - sum_c t_c * x_c
        loss_ref[...] = t_acc[...] * lse - tx_acc[...]


# ---------------------------------------------------------------------------
# Tile selection (sized conservatively for v7x's 64 MiB VMEM / 32 MiB scoped).
# ---------------------------------------------------------------------------

def _choose_tiles(B, C, itemsize):
    budget = 6 * 1024 * 1024  # bytes per input block; x2 buffers, x<=2 inputs
                              # keeps peak < ~24 MiB -> fits default scoped VMEM
                              # on all of v5e / v6e / v7x.
    # Class tile: keep full C unless a (128, C) tile would blow the budget.
    tc = C
    if 128 * C * itemsize > budget and C % 128 == 0:
        for cand in (8192, 4096, 2048, 1024, 512, 256, 128):
            if C % cand == 0 and 128 * cand * itemsize <= budget:
                tc = cand
                break
    # Batch tile: biggest multiple of 8 that fits; prefer divisors of B (no pad).
    max_tb = max(8, (budget // max(1, tc * itemsize)) // 8 * 8)
    tb = None
    for cand in (2048, 1024, 512, 256, 128, 64, 32, 16, 8):
        if cand <= max_tb and B % cand == 0:
            tb = cand
            break
    if tb is None:
        tb = max(8, min(max_tb, 512, (B + 7) // 8 * 8))
    b_pad = pl.cdiv(B, tb) * tb
    return tb, tc, b_pad


# ---------------------------------------------------------------------------
# Wrapper
# ---------------------------------------------------------------------------

def cross_entropy_label_smooth(inputs, targets, weights=1.0, num_classes=None,
                               reduction="mean", *, block_b=None, block_c=None):
    """JAX/Pallas equivalent of CrossEntropyLabelSmooth.forward.

    inputs : (B, C) logits (any float dtype; upcast to f32 inside the kernel)
    targets: (B,) int class labels OR (B, C) soft / one-hot targets
    weights: scalar or per-sample weight broadcastable against (B,)
    """
    del num_classes  # as in the torch module, the class dim of `inputs` rules
    B, C = inputs.shape
    itemsize = jnp.dtype(inputs.dtype).itemsize

    tb, tc, b_pad = _choose_tiles(B, C, itemsize)
    if block_b is not None:
        tb = block_b
        b_pad = pl.cdiv(B, tb) * tb
    if block_c is not None:
        tc = block_c
    assert C % tc == 0, "class tile must divide C"

    x = inputs
    if b_pad != B:
        x = jnp.pad(x, ((0, b_pad - B), (0, 0)))   # padded rows sliced off below

    grid = (b_pad // tb, C // tc)
    compiler_params = pltpu.CompilerParams(
        dimension_semantics=("parallel", "arbitrary"))
    out_shape = jax.ShapeDtypeStruct((b_pad, 1), jnp.float32)
    out_spec = pl.BlockSpec((tb, 1), lambda i, k: (i, 0))
    x_spec = pl.BlockSpec((tb, tc), lambda i, k: (i, k))
    row_scratch = pltpu.VMEM((tb, 1), jnp.float32)

    if targets.ndim == 1:
        # Fast path: integer labels, no one-hot materialization.
        lbl = targets.astype(jnp.int32).reshape(B, 1)
        if b_pad != B:
            lbl = jnp.pad(lbl, ((0, b_pad - B), (0, 0)))
        per_row = pl.pallas_call(
            _ce_int_labels_kernel,
            out_shape=out_shape,
            grid_spec=pltpu.PrefetchScalarGridSpec(
                num_scalar_prefetch=0,
                grid=grid,
                in_specs=[x_spec, pl.BlockSpec((tb, 1), lambda i, k: (i, 0))],
                out_specs=out_spec,
                scratch_shapes=[row_scratch] * 3),
            compiler_params=compiler_params,
        )(x, lbl)
    else:
        # Generic path: soft / one-hot (B, C) targets.
        t = targets
        if b_pad != B:
            t = jnp.pad(t, ((0, b_pad - B), (0, 0)))
        per_row = pl.pallas_call(
            _ce_soft_targets_kernel,
            out_shape=out_shape,
            grid_spec=pltpu.PrefetchScalarGridSpec(
                num_scalar_prefetch=0,
                grid=grid,
                in_specs=[x_spec, pl.BlockSpec((tb, tc), lambda i, k: (i, k))],
                out_specs=out_spec,
                scratch_shapes=[row_scratch] * 4),
            compiler_params=compiler_params,
        )(x, t)

    # Tiny (B,) epilogue: per-sample weight + reduction, done in XLA so the grid
    # batch axis can stay "parallel" (megacore) and padded rows are dropped.
    loss = per_row[:B, 0] * jnp.asarray(weights, dtype=jnp.float32)
    if reduction == "mean":
        return jnp.mean(loss)
    return loss
    # TODO(synk): the original module never applies its label-smoothing epsilon;
    # if smoothing is ever wanted, fold it in as (1-eps)*nll + eps*(-mean(log_probs)).


# ---------------------------------------------------------------------------
# Reference + self-test
# ---------------------------------------------------------------------------

def _reference(inputs, targets, weights=1.0, reduction="mean"):
    log_probs = jax.nn.log_softmax(inputs.astype(jnp.float32), axis=1)
    if targets.ndim == 1:
        targets = jax.nn.one_hot(targets, inputs.shape[1], dtype=jnp.float32)
    loss = jnp.sum(-targets.astype(jnp.float32) * log_probs, axis=1) * weights
    return jnp.mean(loss) if reduction == "mean" else loss


if __name__ == "__main__":
    key = jax.random.PRNGKey(0)
    k1, k2, k3, k4 = jax.random.split(key, 4)

    # Case 1: small, single tile — integer labels, mean reduction.
    B, C = 8, 128
    x = jax.random.normal(k1, (B, C), dtype=jnp.float32)
    y = jax.random.randint(k2, (B,), 0, C, dtype=jnp.int32)

    out = jax.block_until_ready(
        cross_entropy_label_smooth(x, y, weights=1.0, reduction="mean"))
    ref = _reference(x, y, 1.0, "mean")
    assert jnp.allclose(out, ref, atol=1e-5, rtol=1e-5), (out, ref)

    # reduction='none' with a non-unit weight.
    out_n = jax.block_until_ready(
        cross_entropy_label_smooth(x, y, weights=0.5, reduction="none"))
    ref_n = _reference(x, y, 0.5, "none")
    assert jnp.allclose(out_n, ref_n, atol=1e-5, rtol=1e-5)

    # Case 2: exercise the (batch, class) grid + batch padding with forced tiles.
    B2, C2 = 10, 256
    x2 = jax.random.normal(k3, (B2, C2), dtype=jnp.float32)
    y2 = jax.random.randint(k4, (B2,), 0, C2, dtype=jnp.int32)
    out2 = jax.block_until_ready(
        cross_entropy_label_smooth(x2, y2, reduction="none",
                                   block_b=8, block_c=128))
    ref2 = _reference(x2, y2, 1.0, "none")
    assert jnp.allclose(out2, ref2, atol=1e-5, rtol=1e-5)

    # Case 3: soft (one-hot) targets path with bf16 logits (native-dtype input).
    t_soft = jax.nn.one_hot(y, C, dtype=jnp.float32)
    x_bf = x.astype(jnp.bfloat16)
    out3 = jax.block_until_ready(
        cross_entropy_label_smooth(x_bf, t_soft, reduction="mean"))
    ref3 = _reference(x_bf, t_soft, 1.0, "mean")
    assert jnp.allclose(out3, ref3, atol=1e-5, rtol=1e-5), (out3, ref3)

    print("KERNEL_OK")
</pallas_src>

<mosaic_0001>
module attributes {stable_mosaic.version = 11 : i64} {
  func.func @_ce_int_labels_kernel(%arg0: i32, %arg1: i32, %arg2: memref<8x128xf32, #tpu.memory_space<vmem>>, %arg3: memref<8x1xi32, #tpu.memory_space<vmem>>, %arg4: memref<8x1xf32, #tpu.memory_space<vmem>>, %arg5: memref<8x1xf32, #tpu.memory_space<vmem>>, %arg6: memref<8x1xf32, #tpu.memory_space<vmem>>, %arg7: memref<8x1xf32, #tpu.memory_space<vmem>>) attributes {dimension_semantics = [#tpu.dimension_semantics<parallel>, #tpu.dimension_semantics<arbitrary>], iteration_bounds = array<i64: 1, 1>, scalar_prefetch = 0 : i64, scratch_operands = 3 : i64, tpu.core_type = #tpu.core_type<tc>, window_params = [{transform_indices = @transform_0, window_bounds = array<i64: 8, 128>}, {transform_indices = @transform_1, window_bounds = array<i64: 8, 1>}, {transform_indices = @transform_2, window_bounds = array<i64: 8, 1>}]} {
    %c0_i32 = arith.constant 0 : i32
    %0 = arith.cmpi eq, %arg1, %c0_i32 : i32
    %1 = arith.extui %0 : i1 to i32
    %c0_i32_0 = arith.constant 0 : i32
    %2 = arith.cmpi ne, %1, %c0_i32_0 : i32
    scf.if %2 {
      %cst_21 = arith.constant 0xFF800000 : f32
      %37 = vector.broadcast %cst_21 : f32 to vector<8x1xf32>
      %c0_22 = arith.constant 0 : index
      %c0_23 = arith.constant 0 : index
      %38 = vector.load %arg5[%c0_22, %c0_23] : memref<8x1xf32, #tpu.memory_space<vmem>>, vector<8x1xf32>
      tpu.vector_store %arg5[%c0_22, %c0_23], %37 {strides = array<i32>} : memref<8x1xf32, #tpu.memory_space<vmem>>, vector<8x1xf32>,
      %cst_24 = arith.constant 0.000000e+00 : f32
      %39 = vector.broadcast %cst_24 : f32 to vector<8x1xf32>
      %c0_25 = arith.constant 0 : index
      %c0_26 = arith.constant 0 : index
      %40 = vector.load %arg6[%c0_25, %c0_26] : memref<8x1xf32, #tpu.memory_space<vmem>>, vector<8x1xf32>
      tpu.vector_store %arg6[%c0_25, %c0_26], %39 {strides = array<i32>} : memref<8x1xf32, #tpu.memory_space<vmem>>, vector<8x1xf32>,
      %cst_27 = arith.constant 0.000000e+00 : f32
      %41 = vector.broadcast %cst_27 : f32 to vector<8x1xf32>
      %c0_28 = arith.constant 0 : index
      %c0_29 = arith.constant 0 : index
      %42 = vector.load %arg7[%c0_28, %c0_29] : memref<8x1xf32, #tpu.memory_space<vmem>>, vector<8x1xf32>
      tpu.vector_store %arg7[%c0_28, %c0_29], %41 {strides = array<i32>} : memref<8x1xf32, #tpu.memory_space<vmem>>, vector<8x1xf32>,
    } else {
    }
    %c0 = arith.constant 0 : index
    %c0_1 = arith.constant 0 : index
    %3 = vector.load %arg2[%c0, %c0_1] : memref<8x128xf32, #tpu.memory_space<vmem>>, vector<8x128xf32>
    %c0_2 = arith.constant 0 : index
    %c0_3 = arith.constant 0 : index
    %4 = vector.load %arg3[%c0_2, %c0_3] : memref<8x1xi32, #tpu.memory_space<vmem>>, vector<8x1xi32>
    %c128_i32 = arith.constant 128 : i32
    %5 = arith.muli %arg1, %c128_i32 : i32
    %6 = tpu.iota {dimensions = array<i32: 1>} : vector<8x128xi32>
    %7 = vector.broadcast %5 : i32 to vector<8x128xi32>
    %8 = arith.addi %7, %6 : vector<8x128xi32>
    %9 = vector.broadcast %4 : vector<8x1xi32> to vector<8x128xi32>
    %10 = arith.cmpi eq, %8, %9 : vector<8x128xi32>
    %c0_4 = arith.constant 0 : index
    %c0_5 = arith.constant 0 : index
    %11 = vector.load %arg7[%c0_4, %c0_5] : memref<8x1xf32, #tpu.memory_space<vmem>>, vector<8x1xf32>
    %cst = arith.constant 0.000000e+00 : f32
    %12 = vector.broadcast %cst : f32 to vector<8x128xf32>
    %13 = arith.select %10, %3, %12 : vector<8x128xi1>, vector<8x128xf32>
    %cst_6 = arith.constant dense<0.000000e+00> : vector<8xf32>
    %14 = vector.multi_reduction <add>, %13, %cst_6 [1] : vector<8x128xf32> to vector<8xf32>
    %15 = vector.shape_cast %14 : vector<8xf32> to vector<8x1xf32>
    %16 = arith.addf %11, %15 : vector<8x1xf32>
    %c0_7 = arith.constant 0 : index
    %c0_8 = arith.constant 0 : index
    %17 = vector.load %arg7[%c0_7, %c0_8] : memref<8x1xf32, #tpu.memory_space<vmem>>, vector<8x1xf32>
    tpu.vector_store %arg7[%c0_7, %c0_8], %16 {strides = array<i32>} : memref<8x1xf32, #tpu.memory_space<vmem>>, vector<8x1xf32>,
    %c0_9 = arith.constant 0 : index
    %c0_10 = arith.constant 0 : index
    %18 = vector.load %arg5[%c0_9, %c0_10] : memref<8x1xf32, #tpu.memory_space<vmem>>, vector<8x1xf32>
    %cst_11 = arith.constant dense<0xFF800000> : vector<8xf32>
    %19 = vector.multi_reduction <maximumf>, %3, %cst_11 [1] : vector<8x128xf32> to vector<8xf32>
    %20 = vector.shape_cast %19 : vector<8xf32> to vector<8x1xf32>
    %21 = arith.maximumf %18, %20 : vector<8x1xf32>
    %c0_12 = arith.constant 0 : index
    %c0_13 = arith.constant 0 : index
    %22 = vector.load %arg6[%c0_12, %c0_13] : memref<8x1xf32, #tpu.memory_space<vmem>>, vector<8x1xf32>
    %23 = arith.subf %18, %21 : vector<8x1xf32>
    %24 = math.exp %23 : vector<8x1xf32>
    %25 = arith.mulf %22, %24 : vector<8x1xf32>
    %26 = vector.broadcast %21 : vector<8x1xf32> to vector<8x128xf32>
    %27 = arith.subf %3, %26 : vector<8x128xf32>
    %28 = math.exp %27 : vector<8x128xf32>
    %cst_14 = arith.constant dense<0.000000e+00> : vector<8xf32>
    %29 = vector.multi_reduction <add>, %28, %cst_14 [1] : vector<8x128xf32> to vector<8xf32>
    %30 = vector.shape_cast %29 : vector<8xf32> to vector<8x1xf32>
    %31 = arith.addf %25, %30 : vector<8x1xf32>
    %c0_15 = arith.constant 0 : index
    %c0_16 = arith.constant 0 : index
    %32 = vector.load %arg6[%c0_15, %c0_16] : memref<8x1xf32, #tpu.memory_space<vmem>>, vector<8x1xf32>
    tpu.vector_store %arg6[%c0_15, %c0_16], %31 {strides = array<i32>} : memref<8x1xf32, #tpu.memory_space<vmem>>, vector<8x1xf32>,
    %c0_17 = arith.constant 0 : index
    %c0_18 = arith.constant 0 : index
    %33 = vector.load %arg5[%c0_17, %c0_18] : memref<8x1xf32, #tpu.memory_space<vmem>>, vector<8x1xf32>
    tpu.vector_store %arg5[%c0_17, %c0_18], %21 {strides = array<i32>} : memref<8x1xf32, #tpu.memory_space<vmem>>, vector<8x1xf32>,
    %c0_i32_19 = arith.constant 0 : i32
    %34 = arith.cmpi eq, %arg1, %c0_i32_19 : i32
    %35 = arith.extui %34 : i1 to i32
    %c0_i32_20 = arith.constant 0 : i32
    %36 = arith.cmpi ne, %35, %c0_i32_20 : i32
    scf.if %36 {
      %c0_21 = arith.constant 0 : index
      %c0_22 = arith.constant 0 : index
      %37 = vector.load %arg5[%c0_21, %c0_22] : memref<8x1xf32, #tpu.memory_space<vmem>>, vector<8x1xf32>
      %c0_23 = arith.constant 0 : index
      %c0_24 = arith.constant 0 : index
      %38 = vector.load %arg6[%c0_23, %c0_24] : memref<8x1xf32, #tpu.memory_space<vmem>>, vector<8x1xf32>
      %39 = math.log %38 : vector<8x1xf32>
      %40 = arith.addf %37, %39 : vector<8x1xf32>
      %c0_25 = arith.constant 0 : index
      %c0_26 = arith.constant 0 : index
      %41 = vector.load %arg7[%c0_25, %c0_26] : memref<8x1xf32, #tpu.memory_space<vmem>>, vector<8x1xf32>
      %42 = arith.subf %40, %41 : vector<8x1xf32>
      %c0_27 = arith.constant 0 : index
      %c0_28 = arith.constant 0 : index
      %43 = vector.load %arg4[%c0_27, %c0_28] : memref<8x1xf32, #tpu.memory_space<vmem>>, vector<8x1xf32>
      tpu.vector_store %arg4[%c0_27, %c0_28], %42 {strides = array<i32>} : memref<8x1xf32, #tpu.memory_space<vmem>>, vector<8x1xf32>,
    } else {
    }
    return
  }
  func.func @transform_0(%arg0: i32, %arg1: i32) -> (i32, i32) {
    %c0_i32 = arith.constant 0 : i32
    return %arg0, %arg1 : i32, i32
  }
  func.func @transform_1(%arg0: i32, %arg1: i32) -> (i32, i32) {
    %c0_i32 = arith.constant 0 : i32
    %c0_i32_0 = arith.constant 0 : i32
    return %arg0, %c0_i32 : i32, i32
  }
  func.func @transform_2(%arg0: i32, %arg1: i32) -> (i32, i32) {
    %c0_i32 = arith.constant 0 : i32
    %c0_i32_0 = arith.constant 0 : i32
    return %arg0, %c0_i32 : i32, i32
  }
}

</mosaic_0001>

<bundles_post_ra>
// kernel: tpu_custom_call.1
= control target key start
LH: loop header
LB: loop body
LE: loop exit
PB: predicated region body
PF: predicated region fallthrough
CT: control target
= control target key end

     0   :  { %vm15_vm0 = vcmask 7168   ;;  %v85_v1 = vmov -inf   ;;  %v86_v2 = vmov 0   ;;  %v87_v4 = vmov 0.0   ;;  %s119_s0 = inlined_call_operand.vmem [shape: f32[8,128], index: 0, kind: input, shape index: {}]   ;;  %s120_s1 = inlined_call_operand.vmem [shape: s32[8,1], index: 1, kind: input, shape index: {}]   ;;  %s121_s2 = inlined_call_operand.vmem [shape: f32[8,1], index: 2, kind: output, shape index: {}]  }
   0x1   :  { %v19_v0 = vld [vmem:[%s119_s0] sm:$0xff]  ;;  %16 = vst.msk [vmem:[#allocation2] sm:$0xff] %vm15_vm0, %v85_v1  ;;  %77 = vset.pattern.permute.xlu0 %v86_v2  ;;  %78 = vset.pattern.permute.xlu1 %v86_v2  ;;  %17 = vst.msk [vmem:[#allocation3] sm:$0xff] %vm15_vm0, %v87_v4  ;;  %v22_v12 = vlaneseq }
   0x2   :  { %38 = vmax.xlane.f32.xlu0 %v19_v0  ;;  %v20_v3 = vld [vmem:[%s120_s1] sm:$0xff]  ;;  %18 = vst.msk [vmem:[#allocation4] sm:$0xff] %vm15_vm0, %v87_v4 }
   0x3   :  { %27 = vperm.xlu1 %78, %v20_v3   ;;  %v23_v13 = vand.u32 127, %v22_v12 }
   0x8   :  { %v37_v5 = vld [vmem:[#allocation2] sm:$0xff]  ;;  %v41_v19 = vld [vmem:[#allocation3] sm:$0xff] }
   0x9   :  { %v30_v23 = vld [vmem:[#allocation4] sm:$0xff] }
  0x7e   :  { %v28_v14 = vpop.permute.xlu1 %27 }
  0x7f   :  { %vm29_vm1 = vcmp.eq.s32.totalorder %v23_v13, %v28_v14 }
  0x80   :  { %v31_v16 = vsel %vm29_vm1, %v19_v0, 0.0 }
  0x8b   :  { %v39_v6 = vpop.xlane.xlu0 %38 }
  0x8c   :  { %v40_v7 = vmax.f32 %v37_v5, %v39_v6 }
  0x8e   :  { %v42_v8 = vsub.f32 %v37_v5, %v40_v7  ;;  %58 = vst.msk [vmem:[#allocation2] sm:$0xff] %vm15_vm0, %v40_v7  ;;  %48 = vperm.xlu0 %77, %v40_v7  }
  0x90   :  { %v43_v17 = vmul.f32 1.442695, %v42_v8 }
  0x95   :  { %v62_v29 = vld [vmem:[#allocation2] sm:$0xff] }
 0x109   :  { %v49_v9 = vpop.permute.xlu0 %48 }
 0x10a   :  { %v51_v10 = vsub.f32 %v19_v0, %v49_v9 }
 0x10c   :  { %v52_v11 = vmul.f32 1.442695, %v51_v10 }
 0x10e   :  { %79 = vpow2.f32 %v52_v11 }
 0x10f   :  { %81 = vpow2.f32 %v43_v17 }
 0x11b   :  { %v80_v15 = vpop.eup %79 }
 0x11c   :  { %54 = vadd.xlane.f32.xlu1 %v80_v15  ;;  %v82_v18 = vpop.eup %81 }
 0x11d   :  { %v45_v20 = vmul.f32 %v82_v18, %v41_v19 }
 0x120   :  { %32 = vadd.xlane.f32.xlu1 %v31_v16 }
 0x1a5   :  { %v55_v21 = vpop.xlane.xlu1 %54 }
 0x1a6   :  { %v56_v22 = vadd.f32 %v55_v21, %v45_v20 }
 0x1a8   :  { %57 = vst.msk [vmem:[#allocation3] sm:$0xff] %vm15_vm0, %v56_v22 }
 0x1a9   :  { %v33_v24 = vpop.xlane.xlu1 %32 }
 0x1aa   :  { %v34_v25 = vadd.f32 %v33_v24, %v30_v23 }
 0x1ac   :  { %36 = vst.msk [vmem:[#allocation4] sm:$0xff] %vm15_vm0, %v34_v25 }
 0x1af   :  { %v63_v26 = vld [vmem:[#allocation3] sm:$0xff] }
 0x1b0   :  { %83 = vlog2.f32 %v63_v26 }
 0x1b3   :  { %v67_v30 = vld [vmem:[#allocation4] sm:$0xff] }
 0x1bd   :  { %v84_v27 = vpop.eup %83 }
 0x1be   :  { %v65_v28 = vmul.f32 0.6931472, %v84_v27 }
 0x1c0   :  { %v66_v31 = vadd.f32 %v65_v28, %v62_v29 }
 0x1c2   :  { %v68_v32 = vsub.f32 %v66_v31, %v67_v30 }
 0x1c4   :  { %69 = vst.msk [vmem:[%s121_s2] sm:$0xff] %vm15_vm0, %v68_v32 }

</bundles_post_ra>
